<compile_context>
chip_gen: v7x
topology: tpu7x:2x2x1
jax: 0.10.0
libtpu: 0.0.40
codegen_flags: <defaults>
</compile_context>

<pallas_src>
import jax
import jax.numpy as jnp
from jax import lax
from jax.experimental import pallas as pl
from jax.experimental.pallas import tpu as pltpu


def _mlp_brake_kernel(x_ref,
                      w1_ref, b1_ref,
                      w2_ref, b2_ref,
                      w3_ref, b3_ref,
                      w4_ref, b4_ref,
                      o_ref):
    """One batch tile of the fused 4-layer MLP.

    x_ref : (TILE_B, F)      bf16  -- this tile of the input (streamed)
    w*_ref: (out, in)        bf16  -- PyTorch-orientation weights (resident)
    b*_ref: (out, 1)         f32   -- biases (resident)
    o_ref : (num_output, TILE_B) f32 -- lane-dense output tile (batch on lanes)
    """
    x = x_ref[...]  # bf16, no cast needed

    # Layer 1: (H, F) contracted with (TILE_B, F) over F  ->  (H, TILE_B).
    h = lax.dot_general(w1_ref[...], x,
                        dimension_numbers=(((1,), (1,)), ((), ())),
                        preferred_element_type=jnp.float32)
    h = jnp.maximum(h + b1_ref[...], 0.0).astype(jnp.bfloat16)

    # Layer 2: (H, H) @ (H, TILE_B) -> (H, TILE_B)
    h = jnp.dot(w2_ref[...], h, preferred_element_type=jnp.float32)
    h = jnp.maximum(h + b2_ref[...], 0.0).astype(jnp.bfloat16)

    # Layer 3
    h = jnp.dot(w3_ref[...], h, preferred_element_type=jnp.float32)
    h = jnp.maximum(h + b3_ref[...], 0.0).astype(jnp.bfloat16)

    # Layer 4 + sigmoid; result is already lane-dense (num_output, TILE_B).
    y = jnp.dot(w4_ref[...], h, preferred_element_type=jnp.float32) + b4_ref[...]
    o_ref[...] = jax.nn.sigmoid(y)


def torcs_mlp_brake_forward(x, kparams, *, tile_b=512):
    """x: (B, num_features) float32.  kparams: bf16 weights (out,in), f32 biases (out,1)."""
    w1, b1 = kparams["w1"], kparams["b1"]
    w2, b2 = kparams["w2"], kparams["b2"]
    w3, b3 = kparams["w3"], kparams["b3"]
    w4, b4 = kparams["w4"], kparams["b4"]

    B, F = x.shape
    O = w4.shape[0]

    # Batch tile: a multiple of 128 (lane width) so the (O, TILE_B) output
    # block is lane-dense/unmasked; never bigger than the padded batch.
    tile_b = max(128, ((min(tile_b, B) + 127) // 128) * 128)
    b_pad = pl.cdiv(B, tile_b) * tile_b
    n_tiles = b_pad // tile_b

    x_bf16 = x.astype(jnp.bfloat16)
    if b_pad != B:
        x_bf16 = jnp.pad(x_bf16, ((0, b_pad - B), (0, 0)))

    # Weights/biases: full-array blocks, constant index_map -> VMEM-resident.
    resident = lambda a: pl.BlockSpec(a.shape, lambda i: (0, 0))

    out_t = pl.pallas_call(
        _mlp_brake_kernel,
        out_shape=jax.ShapeDtypeStruct((O, b_pad), jnp.float32),
        grid=(n_tiles,),
        in_specs=[pl.BlockSpec((tile_b, F), lambda i: (i, 0)),
                  resident(w1), resident(b1),
                  resident(w2), resident(b2),
                  resident(w3), resident(b3),
                  resident(w4), resident(b4)],
        out_specs=pl.BlockSpec((O, tile_b), lambda i: (0, i)),
        compiler_params=pltpu.CompilerParams(
            dimension_semantics=("parallel",)),
    )(x_bf16, w1, b1, w2, b2, w3, b3, w4, b4)

    # (O, B_pad) lane-dense kernel layout -> (B, O) module layout.
    return out_t[:, :B].T


# ----------------------------------------------------------------------------
# Parameter init / references
# ----------------------------------------------------------------------------
def init_params(key, num_features, num_nodes_hidden, num_output):
    """f32 master params mimicking nn.Linear's U(-1/sqrt(fan_in), 1/sqrt(fan_in)).

    Weights are stored PyTorch-style (out, in); biases as (out, 1).
    """
    dims = [(num_features, num_nodes_hidden),
            (num_nodes_hidden, num_nodes_hidden),
            (num_nodes_hidden, num_nodes_hidden),
            (num_nodes_hidden, num_output)]
    params = {}
    for i, (fan_in, fan_out) in enumerate(dims, start=1):
        key, kw, kb = jax.random.split(key, 3)
        bound = float(fan_in) ** -0.5
        params[f"w{i}"] = jax.random.uniform(
            kw, (fan_out, fan_in), jnp.float32, minval=-bound, maxval=bound)
        params[f"b{i}"] = jax.random.uniform(
            kb, (fan_out, 1), jnp.float32, minval=-bound, maxval=bound)
    return params


def prepare_kernel_params(params):
    """bf16 weights for the MXU path, f32 biases."""
    out = {}
    for i in (1, 2, 3, 4):
        out[f"w{i}"] = params[f"w{i}"].astype(jnp.bfloat16)
        out[f"b{i}"] = params[f"b{i}"]
    return out


def reference_forward_f32(x, params):
    h = jnp.maximum(x @ params["w1"].T + params["b1"].T, 0.0)
    h = jnp.maximum(h @ params["w2"].T + params["b2"].T, 0.0)
    h = jnp.maximum(h @ params["w3"].T + params["b3"].T, 0.0)
    return jax.nn.sigmoid(h @ params["w4"].T + params["b4"].T)


def reference_forward_bf16(x, params):
    """Same bf16-operand / f32-accumulate recipe as the kernel."""
    bf = jnp.bfloat16
    h = x.astype(bf)
    for i in (1, 2, 3):
        w = params[f"w{i}"].astype(bf)
        h = jnp.dot(h, w.T, preferred_element_type=jnp.float32) + params[f"b{i}"].T
        h = jnp.maximum(h, 0.0).astype(bf)
    w4 = params["w4"].astype(bf)
    y = jnp.dot(h, w4.T, preferred_element_type=jnp.float32) + params["b4"].T
    return jax.nn.sigmoid(y)


if __name__ == "__main__":
    num_features, num_nodes_hidden, num_output = 32, 64, 1
    batch = 8

    key = jax.random.PRNGKey(0)
    key, kx = jax.random.split(key)
    x = jax.random.normal(kx, (batch, num_features), jnp.float32)
    params = init_params(key, num_features, num_nodes_hidden, num_output)
    kparams = prepare_kernel_params(params)

    y = torcs_mlp_brake_forward(x, kparams)
    y = jax.block_until_ready(y)
    assert y.shape == (batch, num_output)

    y_ref_bf16 = reference_forward_bf16(x, params)   # matched-precision ref
    y_ref_f32 = reference_forward_f32(x, params)     # full-f32 semantic ref
    assert jnp.allclose(y, y_ref_bf16, atol=2e-3, rtol=2e-3), "mismatch vs bf16 reference"
    assert jnp.allclose(y, y_ref_f32, atol=5e-2, rtol=5e-2), "mismatch vs f32 reference"

    print("KERNEL_OK")
</pallas_src>

<mosaic_0001>
module attributes {stable_mosaic.version = 11 : i64} {
  func.func @_mlp_brake_kernel(%arg0: i32, %arg1: memref<128x32xbf16, #tpu.memory_space<vmem>>, %arg2: memref<64x32xbf16, #tpu.memory_space<vmem>>, %arg3: memref<64x1xf32, #tpu.memory_space<vmem>>, %arg4: memref<64x64xbf16, #tpu.memory_space<vmem>>, %arg5: memref<64x1xf32, #tpu.memory_space<vmem>>, %arg6: memref<64x64xbf16, #tpu.memory_space<vmem>>, %arg7: memref<64x1xf32, #tpu.memory_space<vmem>>, %arg8: memref<1x64xbf16, #tpu.memory_space<vmem>>, %arg9: memref<1x1xf32, #tpu.memory_space<vmem>>, %arg10: memref<1x128xf32, #tpu.memory_space<vmem>>) attributes {dimension_semantics = [#tpu.dimension_semantics<parallel>], iteration_bounds = array<i64: 1>, scalar_prefetch = 0 : i64, scratch_operands = 0 : i64, tpu.core_type = #tpu.core_type<tc>, window_params = [{transform_indices = @transform_0, window_bounds = array<i64: 128, 32>}, {pipeline_mode = #tpu.pipeline_mode<synchronous>, transform_indices = @transform_1, window_bounds = array<i64: 64, 32>}, {pipeline_mode = #tpu.pipeline_mode<synchronous>, transform_indices = @transform_2, window_bounds = array<i64: 64, 1>}, {pipeline_mode = #tpu.pipeline_mode<synchronous>, transform_indices = @transform_3, window_bounds = array<i64: 64, 64>}, {pipeline_mode = #tpu.pipeline_mode<synchronous>, transform_indices = @transform_4, window_bounds = array<i64: 64, 1>}, {pipeline_mode = #tpu.pipeline_mode<synchronous>, transform_indices = @transform_5, window_bounds = array<i64: 64, 64>}, {pipeline_mode = #tpu.pipeline_mode<synchronous>, transform_indices = @transform_6, window_bounds = array<i64: 64, 1>}, {pipeline_mode = #tpu.pipeline_mode<synchronous>, transform_indices = @transform_7, window_bounds = array<i64: 1, 64>}, {pipeline_mode = #tpu.pipeline_mode<synchronous>, transform_indices = @transform_8, window_bounds = array<i64: 1, 1>}, {transform_indices = @transform_9, window_bounds = array<i64: 1, 128>}]} {
    %c0 = arith.constant 0 : index
    %c0_0 = arith.constant 0 : index
    %0 = vector.load %arg1[%c0, %c0_0] : memref<128x32xbf16, #tpu.memory_space<vmem>>, vector<128x32xbf16>
    %c0_1 = arith.constant 0 : index
    %c0_2 = arith.constant 0 : index
    %1 = vector.load %arg2[%c0_1, %c0_2] : memref<64x32xbf16, #tpu.memory_space<vmem>>, vector<64x32xbf16>
    %cst = arith.constant dense<0.000000e+00> : vector<64x128xf32>
    %2 = tpu.matmul %1, %0, %cst {dimension_numbers = #tpu.dot_dimension_numbers<[1], [1], [0], [0], [0, 0, 1, 0], [], []>} : vector<64x32xbf16>, vector<128x32xbf16>, vector<64x128xf32> -> vector<64x128xf32>
    %c0_3 = arith.constant 0 : index
    %c0_4 = arith.constant 0 : index
    %3 = vector.load %arg3[%c0_3, %c0_4] : memref<64x1xf32, #tpu.memory_space<vmem>>, vector<64x1xf32>
    %4 = vector.broadcast %3 : vector<64x1xf32> to vector<64x128xf32>
    %5 = arith.addf %2, %4 : vector<64x128xf32>
    %cst_5 = arith.constant 0.000000e+00 : f32
    %6 = vector.broadcast %cst_5 : f32 to vector<64x128xf32>
    %7 = arith.maximumf %5, %6 : vector<64x128xf32>
    %8 = arith.truncf %7 : vector<64x128xf32> to vector<64x128xbf16>
    %c0_6 = arith.constant 0 : index
    %c0_7 = arith.constant 0 : index
    %9 = vector.load %arg4[%c0_6, %c0_7] : memref<64x64xbf16, #tpu.memory_space<vmem>>, vector<64x64xbf16>
    %cst_8 = arith.constant dense<0.000000e+00> : vector<64x128xf32>
    %10 = tpu.matmul %9, %8, %cst_8 {dimension_numbers = #tpu.dot_dimension_numbers<[1], [0], [0], [1], [0, 0, 1, 1], [], []>} : vector<64x64xbf16>, vector<64x128xbf16>, vector<64x128xf32> -> vector<64x128xf32>
    %c0_9 = arith.constant 0 : index
    %c0_10 = arith.constant 0 : index
    %11 = vector.load %arg5[%c0_9, %c0_10] : memref<64x1xf32, #tpu.memory_space<vmem>>, vector<64x1xf32>
    %12 = vector.broadcast %11 : vector<64x1xf32> to vector<64x128xf32>
    %13 = arith.addf %10, %12 : vector<64x128xf32>
    %cst_11 = arith.constant 0.000000e+00 : f32
    %14 = vector.broadcast %cst_11 : f32 to vector<64x128xf32>
    %15 = arith.maximumf %13, %14 : vector<64x128xf32>
    %16 = arith.truncf %15 : vector<64x128xf32> to vector<64x128xbf16>
    %c0_12 = arith.constant 0 : index
    %c0_13 = arith.constant 0 : index
    %17 = vector.load %arg6[%c0_12, %c0_13] : memref<64x64xbf16, #tpu.memory_space<vmem>>, vector<64x64xbf16>
    %cst_14 = arith.constant dense<0.000000e+00> : vector<64x128xf32>
    %18 = tpu.matmul %17, %16, %cst_14 {dimension_numbers = #tpu.dot_dimension_numbers<[1], [0], [0], [1], [0, 0, 1, 1], [], []>} : vector<64x64xbf16>, vector<64x128xbf16>, vector<64x128xf32> -> vector<64x128xf32>
    %c0_15 = arith.constant 0 : index
    %c0_16 = arith.constant 0 : index
    %19 = vector.load %arg7[%c0_15, %c0_16] : memref<64x1xf32, #tpu.memory_space<vmem>>, vector<64x1xf32>
    %20 = vector.broadcast %19 : vector<64x1xf32> to vector<64x128xf32>
    %21 = arith.addf %18, %20 : vector<64x128xf32>
    %cst_17 = arith.constant 0.000000e+00 : f32
    %22 = vector.broadcast %cst_17 : f32 to vector<64x128xf32>
    %23 = arith.maximumf %21, %22 : vector<64x128xf32>
    %24 = arith.truncf %23 : vector<64x128xf32> to vector<64x128xbf16>
    %c0_18 = arith.constant 0 : index
    %c0_19 = arith.constant 0 : index
    %25 = vector.load %arg8[%c0_18, %c0_19] : memref<1x64xbf16, #tpu.memory_space<vmem>>, vector<1x64xbf16>
    %cst_20 = arith.constant dense<0.000000e+00> : vector<1x128xf32>
    %26 = tpu.matmul %25, %24, %cst_20 {dimension_numbers = #tpu.dot_dimension_numbers<[1], [0], [0], [1], [0, 0, 1, 1], [], []>} : vector<1x64xbf16>, vector<64x128xbf16>, vector<1x128xf32> -> vector<1x128xf32>
    %c0_21 = arith.constant 0 : index
    %c0_22 = arith.constant 0 : index
    %27 = vector.load %arg9[%c0_21, %c0_22] : memref<1x1xf32, #tpu.memory_space<vmem>>, vector<1x1xf32>
    %28 = vector.broadcast %27 : vector<1x1xf32> to vector<1x128xf32>
    %29 = arith.addf %26, %28 : vector<1x128xf32>
    %30 = arith.negf %29 : vector<1x128xf32>
    %31 = math.exp %30 : vector<1x128xf32>
    %cst_23 = arith.constant 1.000000e+00 : f32
    %32 = vector.broadcast %cst_23 : f32 to vector<1x128xf32>
    %33 = arith.addf %32, %31 : vector<1x128xf32>
    %34 = arith.divf %32, %33 : vector<1x128xf32>
    %c0_24 = arith.constant 0 : index
    %c0_25 = arith.constant 0 : index
    %35 = vector.load %arg10[%c0_24, %c0_25] : memref<1x128xf32, #tpu.memory_space<vmem>>, vector<1x128xf32>
    tpu.vector_store %arg10[%c0_24, %c0_25], %34 {strides = array<i32>} : memref<1x128xf32, #tpu.memory_space<vmem>>, vector<1x128xf32>,
    return
  }
  func.func @transform_0(%arg0: i32) -> (i32, i32) {
    %c0_i32 = arith.constant 0 : i32
    %c0_i32_0 = arith.constant 0 : i32
    return %arg0, %c0_i32 : i32, i32
  }
  func.func @transform_1(%arg0: i32) -> (i32, i32) {
    %c0_i32 = arith.constant 0 : i32
    %c0_i32_0 = arith.constant 0 : i32
    %c0_i32_1 = arith.constant 0 : i32
    return %c0_i32, %c0_i32_0 : i32, i32
  }
  func.func @transform_2(%arg0: i32) -> (i32, i32) {
    %c0_i32 = arith.constant 0 : i32
    %c0_i32_0 = arith.constant 0 : i32
    %c0_i32_1 = arith.constant 0 : i32
    return %c0_i32, %c0_i32_0 : i32, i32
  }
  func.func @transform_3(%arg0: i32) -> (i32, i32) {
    %c0_i32 = arith.constant 0 : i32
    %c0_i32_0 = arith.constant 0 : i32
    %c0_i32_1 = arith.constant 0 : i32
    return %c0_i32, %c0_i32_0 : i32, i32
  }
  func.func @transform_4(%arg0: i32) -> (i32, i32) {
    %c0_i32 = arith.constant 0 : i32
    %c0_i32_0 = arith.constant 0 : i32
    %c0_i32_1 = arith.constant 0 : i32
    return %c0_i32, %c0_i32_0 : i32, i32
  }
  func.func @transform_5(%arg0: i32) -> (i32, i32) {
    %c0_i32 = arith.constant 0 : i32
    %c0_i32_0 = arith.constant 0 : i32
    %c0_i32_1 = arith.constant 0 : i32
    return %c0_i32, %c0_i32_0 : i32, i32
  }
  func.func @transform_6(%arg0: i32) -> (i32, i32) {
    %c0_i32 = arith.constant 0 : i32
    %c0_i32_0 = arith.constant 0 : i32
    %c0_i32_1 = arith.constant 0 : i32
    return %c0_i32, %c0_i32_0 : i32, i32
  }
  func.func @transform_7(%arg0: i32) -> (i32, i32) {
    %c0_i32 = arith.constant 0 : i32
    %c0_i32_0 = arith.constant 0 : i32
    %c0_i32_1 = arith.constant 0 : i32
    return %c0_i32, %c0_i32_0 : i32, i32
  }
  func.func @transform_8(%arg0: i32) -> (i32, i32) {
    %c0_i32 = arith.constant 0 : i32
    %c0_i32_0 = arith.constant 0 : i32
    %c0_i32_1 = arith.constant 0 : i32
    return %c0_i32, %c0_i32_0 : i32, i32
  }
  func.func @transform_9(%arg0: i32) -> (i32, i32) {
    %c0_i32 = arith.constant 0 : i32
    %c0_i32_0 = arith.constant 0 : i32
    return %c0_i32, %arg0 : i32, i32
  }
}

</mosaic_0001>

<bundles_post_ra>
// kernel: tpu_custom_call.1
= control target key start
LH: loop header
LB: loop body
LE: loop exit
PB: predicated region body
PF: predicated region fallthrough
CT: control target
= control target key end

     0   :  { %s1118_s0 = inlined_call_operand.vmem [shape: bf16[128,32], index: 0, kind: input, shape index: {}]   ;;  %s1119_s1 = inlined_call_operand.vmem [shape: bf16[64,32], index: 1, kind: input, shape index: {}]   ;;  %s1120_s2 = inlined_call_operand.vmem [shape: f32[64,1], index: 2, kind: input, shape index: {}]   ;;  %s1121_s3 = inlined_call_operand.vmem [shape: bf16[64,64], index: 3, kind: input, shape index: {}]   ;;  %s1122_s4 = inlined_call_operand.vmem [shape: f32[64,1], index: 4, kind: input, shape index: {}]   ;;  %s1123_s5 = inlined_call_operand.vmem [shape: bf16[64,64], index: 5, kind: input, shape index: {}]   ;;  %s1124_s6 = inlined_call_operand.vmem [shape: f32[64,1], index: 6, kind: input, shape index: {}]   ;;  %s1125_s7 = inlined_call_operand.vmem [shape: bf16[1,64], index: 7, kind: input, shape index: {}]   ;;  %s1126_s8 = inlined_call_operand.<no memory space> [shape: f32[1,1], index: 8, kind: input, shape index: {}]   ;;  %s1127_s9 = inlined_call_operand.hbm [shape: f32[1,128], index: 9, kind: output, shape index: {}]  }
   0x1   :  { %v14_v0 = vstv %s1126_s8 }
   0x2   :  { %15 = vst [vmem:[#allocation2] sm:$0x1] %v14_v0 }
   0x3   :  { %v837_v1 = vld [vmem:[%s1118_s0] sm:$0xff]   ;;  %vm168_vm0 = vcmask 261120   ;;  %v838_v2 = vld [vmem:[%s1118_s0 + $0x8] sm:$0xff]   ;;  %v885_v4 = vmov 0   ;;  %v839_v5 = vld [vmem:[%s1118_s0 + $0x10] sm:$0xff]  }
   0x4   :  { %823 = vmatprep.subr.msk.bf16.mxu0 %vm168_vm0, %v837_v1  ;;  %v182_v3 = vsel %vm168_vm0, %v837_v1, 0  ;;  %835 = vset.pattern.permute.xlu0 %v885_v4  ;;  %v185_v6 = vsel %vm168_vm0, %v838_v2, 0  ;;  %v845_v7 = vld [vmem:[%s1119_s1] sm:$0xff]   ;;  %v62_v9 = vld [vmem:[%s1120_s2 + $0x10] sm:$0xff]  ;;  %v61_v10 = vld [vmem:[%s1120_s2 + $0x8] sm:$0xff]  ;;  %v188_v12 = vsel %vm168_vm0, %v839_v5, 0 }
   0x5   :  { %756 = vmatpush3.bf16.xpose.msra.mxu0 %v182_v3  ;;  %836 = vset.pattern.permute.xlu1 %v885_v4  ;;  %v60_v8 = vld [vmem:[%s1120_s2] sm:$0xff]  ;;  %v63_v11 = vld [vmem:[%s1120_s2 + $0x18] sm:$0xff]  ;;  %v65_v15 = vld [vmem:[%s1120_s2 + $0x28] sm:$0xff] }
   0x6   :  { %824 = vmatprep.subr.msk.bf16.mxu0 %vm168_vm0, %v838_v2  ;;  %771 = vmatprep.mubr.msk.bf16.mxu0 %vm168_vm0, %v845_v7  ;;  %v840_v13 = vld [vmem:[%s1118_s0 + $0x18] sm:$0xff]   ;;  %v64_v14 = vld [vmem:[%s1120_s2 + $0x20] sm:$0xff]  ;;  %v66_v17 = vld [vmem:[%s1120_s2 + $0x30] sm:$0xff] }
   0x7   :  { %70 = vperm.xlu0 %835, %v60_v8   ;;  %80 = vperm.xlu1 %836, %v62_v9   ;;  %v191_v16 = vsel %vm168_vm0, %v840_v13, 0  ;;  %v67_v18 = vld [vmem:[%s1120_s2 + $0x38] sm:$0xff]  ;;  %v841_v19 = vld [vmem:[%s1118_s0 + $0x20] sm:$0xff]  }
   0xb   :  { %75 = vperm.xlu0 %835, %v61_v10   ;;  %85 = vperm.xlu1 %836, %v63_v11  }
   0xd   :  { %758 = vmatpush3.bf16.xpose.msra.mxu0 %v185_v6 }
   0xe   :  { %825 = vmatprep.subr.msk.bf16.mxu0 %vm168_vm0, %v839_v5 }
   0xf   :  { %90 = vperm.xlu0 %835, %v64_v14   ;;  %95 = vperm.xlu1 %836, %v65_v15  }
  0x13   :  { %100 = vperm.xlu0 %835, %v66_v17   ;;  %105 = vperm.xlu1 %836, %v67_v18  }
  0x15   :  { %760 = vmatpush3.bf16.xpose.msra.mxu0 %v188_v12 }
  0x16   :  { %826 = vmatprep.subr.msk.bf16.mxu0 %vm168_vm0, %v840_v13 }
  0x17   :  { %16 = vsyncpa [#allocation4], 0  ;;  %v290_v20 = vld [vmem:[%s1122_s4] sm:$0xff]  ;;  %v291_v21 = vld [vmem:[%s1122_s4 + $0x8] sm:$0xff]  ;;  %v194_v24 = vsel %vm168_vm0, %v841_v19, 0  ;;  %vm358_vm1 = vcmask 523264  }
  0x18   :  { %300 = vperm.xlu0 %835, %v290_v20   ;;  %305 = vperm.xlu1 %836, %v291_v21   ;;  %v292_v22 = vld [vmem:[%s1122_s4 + $0x10] sm:$0xff]  ;;  %v293_v23 = vld [vmem:[%s1122_s4 + $0x18] sm:$0xff]  ;;  %v842_v25 = vld [vmem:[%s1118_s0 + $0x28] sm:$0xff]   ;;  %vm887_vm2 = vmmov 0   ;;  %s888_s24 = smov [#allocation3]  }
  0x19   :  { %v294_v26 = vld [vmem:[%s1122_s4 + $0x20] sm:$0xff]  ;;  %v295_v27 = vld [vmem:[%s1122_s4 + $0x28] sm:$0xff]  ;;  %v296_v28 = vld [vmem:[%s1122_s4 + $0x30] sm:$0xff]  ;;  %v197_v30 = vsel %vm168_vm0, %v842_v25, 0  ;;  %s680_s25 = sshll.u32 %s888_s24, 4  ;;  %s681_s25 = int_to_ptr.vmem [resolvable:$true] %s680_s25 }
  0x1a   :  { %v297_v29 = vld [vmem:[%s1122_s4 + $0x38] sm:$0xff]  ;;  %v843_v31 = vld [vmem:[%s1118_s0 + $0x30] sm:$0xff]   ;;  %v456_v32 = vld [vmem:[%s1124_s6] sm:$0xff]  ;;  %s865_s26 = scalar_lea.vmem %s681_s25, 32  ;;  %p866_p1 = scmp.lt.s32.totalorder %s681_s25, %s681_s25 }
  0x1b   :  { %v457_v33 = vld [vmem:[%s1124_s6 + $0x8] sm:$0xff]  ;;  %v458_v34 = vld [vmem:[%s1124_s6 + $0x10] sm:$0xff]  ;;  %v459_v35 = vld [vmem:[%s1124_s6 + $0x18] sm:$0xff]  ;;  %v200_v36 = vsel %vm168_vm0, %v843_v31, 0 }
  0x1c   :  { %310 = vperm.xlu0 %835, %v292_v22   ;;  %315 = vperm.xlu1 %836, %v293_v23   ;;  %v844_v37 = vld [vmem:[%s1118_s0 + $0x38] sm:$0xff]   ;;  %v460_v38 = vld [vmem:[%s1124_s6 + $0x20] sm:$0xff]  ;;  %v461_v39 = vld [vmem:[%s1124_s6 + $0x28] sm:$0xff] }
  0x1d   :  { %762 = vmatpush3.bf16.xpose.msra.mxu0 %v191_v16  ;;  %v462_v40 = vld [vmem:[%s1124_s6 + $0x30] sm:$0xff]  ;;  %v463_v41 = vld [vmem:[%s1124_s6 + $0x38] sm:$0xff]  ;;  %v203_v42 = vsel %vm168_vm0, %v844_v37, 0  ;;  %v614_v43 = vld [vmem:[#allocation2] sm:$0x1] }
  0x1e   :  { %827 = vmatprep.subr.msk.bf16.mxu0 %vm168_vm0, %v841_v19  ;;  %v846_v44 = vld [vmem:[%s1119_s1 + $0x8] sm:$0xff]   ;;  %v847_v45 = vld [vmem:[%s1119_s1 + $0x10] sm:$0xff]   ;;  %v848_v46 = vld [vmem:[%s1119_s1 + $0x18] sm:$0xff]  }
  0x1f   :  { %v849_v47 = vld [vmem:[%s1121_s3] sm:$0xff]   ;;  %v850_v20 = vld [vmem:[%s1121_s3 + $0x8] sm:$0xff]   ;;  %v851_v21 = vld [vmem:[%s1121_s3 + $0x10] sm:$0xff]  }
  0x20   :  { %320 = vperm.xlu0 %835, %v294_v26   ;;  %325 = vperm.xlu1 %836, %v295_v27   ;;  %v852_v22 = vld [vmem:[%s1121_s3 + $0x18] sm:$0xff]   ;;  %v853_v23 = vld [vmem:[%s1123_s5] sm:$0xff]  }
  0x21   :  { %787 = vmatprep.mubr.msk.bf16.mxu1 %vm358_vm1, %v849_v47 }
  0x24   :  { %330 = vperm.xlu0 %835, %v296_v28   ;;  %335 = vperm.xlu1 %836, %v297_v29  }
  0x25   :  { %764 = vmatpush3.bf16.xpose.msra.mxu0 %v194_v24 }
  0x26   :  { %828 = vmatprep.subr.msk.bf16.mxu0 %vm168_vm0, %v842_v25 }
  0x28   :  { %466 = vperm.xlu0 %835, %v456_v32   ;;  %471 = vperm.xlu1 %836, %v457_v33  }
  0x2c   :  { %476 = vperm.xlu0 %835, %v458_v34   ;;  %481 = vperm.xlu1 %836, %v459_v35  }
  0x2d   :  { %766 = vmatpush3.bf16.xpose.msra.mxu0 %v197_v30 }
  0x2e   :  { %829 = vmatprep.subr.msk.bf16.mxu0 %vm168_vm0, %v843_v31 }
  0x30   :  { %486 = vperm.xlu0 %835, %v460_v38   ;;  %491 = vperm.xlu1 %836, %v461_v39  }
  0x34   :  { %496 = vperm.xlu0 %835, %v462_v40   ;;  %501 = vperm.xlu1 %836, %v463_v41  }
  0x35   :  { %768 = vmatpush3.bf16.xpose.msra.mxu0 %v200_v36 }
  0x36   :  { %830 = vmatprep.subr.msk.bf16.mxu0 %vm168_vm0, %v844_v37 }
  0x38   :  { %617 = vperm.xlu0 %835, %v614_v43  }
  0x3d   :  { %770 = vmatpush3.bf16.xpose.msra.mxu0 %v203_v42 }
  0x44   :  { %772 = vmatmul.mubr.msk.bf16.vlgmr.msra.gmra.mrb[0].mxu0 %vm168_vm0, %v846_v44 }
  0x45   :  { %775 = vmatprep.mubr.msk.bf16.mxu0 %vm168_vm0, %v847_v45 }
  0x4c   :  { %776 = vmatmul.mubr.msk.bf16.gmra.mrb[4].mxu0 %vm168_vm0, %v848_v46 }
  0x86   :  { %v71_v48 = vpop.permute.xlu0 %70  ;;  %v81_v49 = vpop.permute.xlu1 %80 }
  0x8a   :  { %v76_v50 = vpop.permute.xlu0 %75  ;;  %v86_v51 = vpop.permute.xlu1 %85 }
  0x8e   :  { %v91_v55 = vpop.permute.xlu0 %90  ;;  %v96_v60 = vpop.permute.xlu1 %95 }
  0x92   :  { %v101_v3 = vpop.permute.xlu0 %100  ;;  %v106_v8 = vpop.permute.xlu1 %105 }
  0x97   :  { %v301_v24 = vpop.permute.xlu0 %300  ;;  %v306_v25 = vpop.permute.xlu1 %305 }
  0x9b   :  { %v311_v26 = vpop.permute.xlu0 %310  ;;  %v316_v27 = vpop.permute.xlu1 %315 }
  0x9f   :  { %v321_v31 = vpop.permute.xlu0 %320  ;;  %v326_v36 = vpop.permute.xlu1 %325 }
  0xa3   :  { %v331_v43 = vpop.permute.xlu0 %330 }
 0x117   :  { %v773_v52 = vpop.f32.mrb[0].mxu0 }
 0x118   :  { %v248_v53 = vadd.f32 %v773_v52, %v81_v49  ;;  %v239_v54 = vpop.f32.mrb[1].mxu0 }
 0x119   :  { %v240_v56 = vadd.f32 %v239_v54, %v71_v48  ;;  %v774_v57 = vpop.f32.mrb[2].mxu0  ;;  %v336_v48 = vpop.permute.xlu1 %335 }
 0x11a   :  { %v251_v58 = vadd.f32 %v774_v57, %v86_v51  ;;  %v242_v59 = vpop.f32.mrb[3].mxu0  ;;  %v272_v62 = vmax.f32 %v248_v53, 0.0 }
 0x11b   :  { %v243_v61 = vadd.f32 %v242_v59, %v76_v50  ;;  %v270_v0 = vmax.f32 %v240_v56, 0.0 }
 0x11c   :  { %v273_v63 = vmax.f32 %v251_v58, 0.0 }
 0x11d   :  { %v271_v1 = vmax.f32 %v243_v61, 0.0  ;;  %v855_v61 = vld [vmem:[%s1123_s5 + $0x10] sm:$0xff]  }
 0x11e   :  { %v279_v2 = vpack.c.bf16 %v273_v63, %v272_v62  ;;  %v856_v62 = vld [vmem:[%s1123_s5 + $0x18] sm:$0xff]   ;;  %v886_v63 = vmov 0.0  }
 0x11f   :  { %v777_v4 = vpop.f32.mrb[4].mxu0  ;;  %v278_v5 = vpack.c.bf16 %v271_v1, %v270_v0  ;;  %v467_v0 = vpop.permute.xlu0 %466 }
 0x120   :  { %v264_v6 = vadd.f32 %v777_v4, %v101_v3  ;;  %v255_v7 = vpop.f32.mrb[5].mxu0  ;;  %v472_v1 = vpop.permute.xlu1 %471 }
 0x121   :  { %v256_v9 = vadd.f32 %v255_v7, %v91_v55  ;;  %v778_v10 = vpop.f32.mrb[6].mxu0  ;;  %779 = vmatprep.subr.bf16.mxu1 %v278_v5 }
 0x122   :  { %v267_v11 = vadd.f32 %v778_v10, %v106_v8  ;;  %v258_v12 = vpop.f32.mrb[7].mxu0  ;;  %780 = vmatpush3.bf16.msra.mxu1 %v278_v5  ;;  %v276_v14 = vmax.f32 %v264_v6, 0.0 }
 0x123   :  { %v259_v13 = vadd.f32 %v258_v12, %v96_v60  ;;  %781 = vmatprep.subr.bf16.mxu1 %v279_v2  ;;  %v274_v16 = vmax.f32 %v256_v9, 0.0  ;;  %v854_v60 = vld [vmem:[%s1123_s5 + $0x8] sm:$0xff]  }
 0x124   :  { %v277_v15 = vmax.f32 %v267_v11, 0.0  ;;  %v482_v3 = vpop.permute.xlu1 %481 }
 0x125   :  { %v275_v17 = vmax.f32 %v259_v13, 0.0 }
 0x126   :  { %v281_v18 = vpack.c.bf16 %v277_v15, %v276_v14  ;;  %782 = vmatpush3.bf16.msra.mxu1 %v279_v2  ;;  %v477_v2 = vpop.permute.xlu0 %476 }
 0x127   :  { %v280_v19 = vpack.c.bf16 %v275_v17, %v274_v16 }
 0x128   :  { %v492_v12 = vpop.permute.xlu1 %491 }
 0x129   :  { %783 = vmatprep.subr.bf16.mxu1 %v280_v19 }
 0x12a   :  { %784 = vmatpush3.bf16.msra.mxu1 %v280_v19  ;;  %v487_v7 = vpop.permute.xlu0 %486 }
 0x12b   :  { %785 = vmatprep.subr.bf16.mxu1 %v281_v18 }
 0x12e   :  { %786 = vmatpush3.bf16.msra.mxu1 %v281_v18  ;;  %v497_v19 = vpop.permute.xlu0 %496 }
 0x131   :  { %788 = vmatmul.mubr.msk.bf16.vlgmr.msra.gmra.mrb[0].mxu1 %vm358_vm1, %v850_v20 }
 0x132   :  { %791 = vmatprep.mubr.msk.bf16.mxu1 %vm358_vm1, %v851_v21 }
 0x139   :  { %792 = vmatmul.mubr.msk.bf16.gmra.mrb[4].mxu1 %vm358_vm1, %v852_v22 }
 0x13a   :  { %803 = vmatprep.mubr.msk.bf16.mxu1 %vm358_vm1, %v853_v23 }
 0x204   :  { %v789_v28 = vpop.f32.mrb[0].mxu1 }
 0x205   :  { %v414_v29 = vadd.f32 %v789_v28, %v311_v26  ;;  %v405_v30 = vpop.f32.mrb[1].mxu1 }
 0x206   :  { %v406_v32 = vadd.f32 %v405_v30, %v301_v24  ;;  %v790_v33 = vpop.f32.mrb[2].mxu1  ;;  %v502_v24 = vpop.permute.xlu1 %501 }
 0x207   :  { %v417_v34 = vadd.f32 %v790_v33, %v316_v27  ;;  %v408_v35 = vpop.f32.mrb[3].mxu1  ;;  %v438_v38 = vmax.f32 %v414_v29, 0.0 }
 0x208   :  { %v409_v37 = vadd.f32 %v408_v35, %v306_v25  ;;  %v436_v40 = vmax.f32 %v406_v32, 0.0 }
 0x209   :  { %v439_v39 = vmax.f32 %v417_v34, 0.0 }
 0x20a   :  { %v437_v41 = vmax.f32 %v409_v37, 0.0  ;;  %v620_v37 = vlaneseq }
 0x20b   :  { %v445_v42 = vpack.c.bf16 %v439_v39, %v438_v38 }
 0x20c   :  { %v444_v44 = vpack.c.bf16 %v437_v41, %v436_v40  ;;  %v793_v45 = vpop.f32.mrb[4].mxu1  ;;  %v621_v38 = vshrl.u32 %v620_v37, 7  ;;  %v618_v40 = vpop.permute.xlu0 %617 }
 0x20d   :  { %v430_v46 = vadd.f32 %v793_v45, %v331_v43  ;;  %v421_v47 = vpop.f32.mrb[5].mxu1 }
 0x20e   :  { %v422_v49 = vadd.f32 %v421_v47, %v321_v31  ;;  %v794_v50 = vpop.f32.mrb[6].mxu1  ;;  %795 = vmatprep.subr.bf16.mxu1 %v444_v44  ;;  %v622_v39 = vsub.s32 0, %v621_v38 }
 0x20f   :  { %v433_v51 = vadd.f32 %v794_v50, %v336_v48  ;;  %v424_v52 = vpop.f32.mrb[7].mxu1  ;;  %796 = vmatpush3.bf16.msra.mxu1 %v444_v44  ;;  %v442_v54 = vmax.f32 %v430_v46, 0.0 }
 0x210   :  { %v425_v53 = vadd.f32 %v424_v52, %v326_v36  ;;  %797 = vmatprep.subr.bf16.mxu1 %v445_v42  ;;  %v440_v56 = vmax.f32 %v422_v49, 0.0  ;;  %v613_v36 = vld [vmem:[%s1125_s7] sm:$0x1]  ;;  %v623_v41 = vrot.slane %v618_v40, %v622_v39  ;;  %s861_s7 = scalar_lea.vmem %s681_s25, 16 }
 0x211   :  { %v443_v55 = vmax.f32 %v433_v51, 0.0  ;;  %p862_p0 = scmp.ne.s32.totalorder %s681_s25, %s861_s7  ;;  %p867_p2 = scmp.lt.s32.totalorder %s865_s26, %s861_s7 }
 0x212   :  { %v441_v57 = vmax.f32 %v425_v53, 0.0 }
 0x213   :  { %v447_v58 = vpack.c.bf16 %v443_v55, %v442_v54  ;;  %798 = vmatpush3.bf16.msra.mxu1 %v445_v42  ;;  %p868_p3 = por %p867_p2, %p866_p1 }
 0x214   :  { %v446_v59 = vpack.c.bf16 %v441_v57, %v440_v56 }
 0x215   :  { %p869_p4 = pnand %p868_p3, %p862_p0 }
 0x216   :  { %799 = vmatprep.subr.bf16.mxu1 %v446_v59 }
 0x217   :  { %800 = vmatpush3.bf16.msra.mxu1 %v446_v59 }
 0x218   :  { %801 = vmatprep.subr.bf16.mxu1 %v447_v58 }
 0x21b   :  { %802 = vmatpush3.bf16.msra.mxu1 %v447_v58 }
 0x21c   :  { %811 = vmatprep.subr.bf16.mxu1 %v886_v63 }
 0x21e   :  { %804 = vmatmul.mubr.msk.bf16.vlgmr.msra.gmra.mrb[8].mxu1 %vm358_vm1, %v854_v60 }
 0x21f   :  { %807 = vmatprep.mubr.msk.bf16.mxu1 %vm358_vm1, %v855_v61 }
 0x226   :  { %808 = vmatmul.mubr.msk.bf16.gmra.mrb[12].mxu1 %vm358_vm1, %v856_v62 }
 0x227   :  { %819 = vmatprep.mubr.msk.bf16.mxu1 %vm887_vm2, %v886_v63 }
 0x2f1   :  { %v805_v4 = vpop.f32.mrb[8].mxu1 }
 0x2f2   :  { %v579_v5 = vadd.f32 %v805_v4, %v477_v2  ;;  %v570_v6 = vpop.f32.mrb[9].mxu1 }
 0x2f3   :  { %v571_v8 = vadd.f32 %v570_v6, %v467_v0  ;;  %v806_v9 = vpop.f32.mrb[10].mxu1 }
 0x2f4   :  { %v582_v10 = vadd.f32 %v806_v9, %v482_v3  ;;  %v573_v11 = vpop.f32.mrb[11].mxu1  ;;  %v603_v14 = vmax.f32 %v579_v5, 0.0 }
 0x2f5   :  { %v574_v13 = vadd.f32 %v573_v11, %v472_v1  ;;  %v601_v16 = vmax.f32 %v571_v8, 0.0 }
 0x2f6   :  { %v604_v15 = vmax.f32 %v582_v10, 0.0 }
 0x2f7   :  { %v602_v17 = vmax.f32 %v574_v13, 0.0 }
 0x2f8   :  { %v610_v18 = vpack.c.bf16 %v604_v15, %v603_v14 }
 0x2f9   :  { %v609_v20 = vpack.c.bf16 %v602_v17, %v601_v16  ;;  %v809_v21 = vpop.f32.mrb[12].mxu1 }
 0x2fa   :  { %v595_v22 = vadd.f32 %v809_v21, %v497_v19  ;;  %v586_v23 = vpop.f32.mrb[13].mxu1 }
 0x2fb   :  { %v587_v25 = vadd.f32 %v586_v23, %v487_v7  ;;  %v810_v26 = vpop.f32.mrb[14].mxu1  ;;  %812 = vmatpush3.bf16.msra.mxu1 %v609_v20 }
 0x2fc   :  { %v598_v27 = vadd.f32 %v810_v26, %v502_v24  ;;  %v589_v28 = vpop.f32.mrb[15].mxu1  ;;  %813 = vmatprep.subr.bf16.mxu1 %v886_v63  ;;  %v607_v30 = vmax.f32 %v595_v22, 0.0 }
 0x2fd   :  { %v590_v29 = vadd.f32 %v589_v28, %v492_v12  ;;  %v605_v32 = vmax.f32 %v587_v25, 0.0 }
 0x2fe   :  { %v608_v31 = vmax.f32 %v598_v27, 0.0 }
 0x2ff   :  { %v606_v33 = vmax.f32 %v590_v29, 0.0  ;;  %814 = vmatpush3.bf16.msra.mxu1 %v610_v18 }
 0x300   :  { %v612_v34 = vpack.c.bf16 %v608_v31, %v607_v30  ;;  %815 = vmatprep.subr.bf16.mxu1 %v886_v63 }
 0x301   :  { %v611_v35 = vpack.c.bf16 %v606_v33, %v605_v32 }
 0x303   :  { %816 = vmatpush3.bf16.msra.mxu1 %v611_v35 }
 0x304   :  { %817 = vmatprep.subr.bf16.mxu1 %v886_v63 }
 0x307   :  { %818 = vmatpush3.bf16.msra.mxu1 %v612_v34 }
 0x30a   :  { %820 = vmatmul.mubr.msk.bf16.vlgmr.msra.gmra.mrb[16].mxu1 %vm358_vm1, %v613_v36 }
 0x3dd   :  { %v661_v42 = vpop.f32.mrb[16].mxu1 }
 0x3de   :  { %v662_v43 = vadd.f32 %v661_v42, %v623_v41  ;;  %v821_v44 = vpop.f32.mrb[17].mxu1 }
 0x3df   :  { %v664_v45 = vpop.f32.mrb[18].mxu1 }
 0x3e0   :  { %v721_v46 = vmul.f32 -1.442695, %v662_v43  ;;  %v822_v47 = vpop.f32.mrb[19].mxu1 }
 0x3e2   :  { %857 = vpow2.f32 %v721_v46 }
 0x3ec   :  { %v858_v48 = vpop.eup %857 }
 0x3ed   :  { %v670_v49 = vadd.f32 1.0, %v858_v48 }
 0x3ef   :  { %859 = vrcp.f32 %v670_v49 }
 0x3f9   :  { %v860_v50 = vpop.eup %859 }
 0x3fa   :  { %673 = vst [vmem:[#allocation3] sm:$0x1] %v860_v50 }
 0x3fb   :  { %872 = shalt.err (!%p869_p4)
}
 0x3fc   :  { %s873_s28 = scalar_lea.hbm %s1127_s9, 16 }
 0x3fd   :  { %p874_p5 = scmp.ne.s32.totalorder %s1127_s9, %s873_s28  ;;  %p877_p6 = scmp.lt.u32.totalorder %s873_s28, %s1127_s9 }
 0x3ff   :  { %p879_p7 = pnand %p877_p6, %p874_p5 }
 0x401   :  { %882 = shalt.err (!%p879_p7)
}
 0x402   :  { %683 = dma.vmem_to_hbm [thread:$0]  %s681_s25, 16, %s1127_s9, [#allocation4]  }
 0x403   :  { %883 = dma.done.wait [#allocation4], 16  }
 0x404   :  { %884 = vsyncadd [#allocation4], 4294967280 }
 0x405   :  { %687 = vsyncpa [#allocation4], 1 }

</bundles_post_ra>
